<compile_context>
chip_gen: v7x
topology: tpu7x:2x2x1
jax: 0.10.0
libtpu: 0.0.40
codegen_flags: <defaults>
</compile_context>

<pallas_src>
import functools
import math

import jax
import jax.numpy as jnp
from jax.experimental import pallas as pl
from jax.experimental.pallas import tpu as pltpu


def _pma_kernel(q_res_ref, q_blk_ref, mask_ref, x_ref, wkv_ref, bkv_ref,
                wo_ref, bo_ref, o_ref):
    """Fused MAB(S, X) forward for one batch tile.

    q_res_ref : (S, D)    f32   hoisted Q projection (residual term)
    q_blk_ref : (H*S, D)  cdt   block-diagonal Q, pre-scaled by 1/sqrt(D)
    mask_ref  : (H*S, D)  f32   block-diagonal head mask (matches q_blk zeros)
    x_ref     : (TB, N, D) cdt
    wkv_ref   : (D, 2D)   cdt   fused [Wk | Wv] in (in, out) layout
    bkv_ref   : (1, 2D)   f32
    wo_ref    : (D, D)    cdt
    bo_ref    : (1, D)    f32
    o_ref     : (TB, S, D) f32
    """
    cdt = wkv_ref.dtype
    tb, n, d = x_ref.shape
    s_len = q_res_ref.shape[0]
    hs = q_blk_ref.shape[0]
    num_heads = hs // s_len
    approx = jnp.dtype(cdt) != jnp.float32     # exact divide on the f32 path

    x2d = x_ref[...].reshape(tb * n, d)

    # Fused K/V projection: one (TB*N, D) x (D, 2D) matmul, f32 accumulate.
    kv = (jnp.dot(x2d, wkv_ref[...], preferred_element_type=jnp.float32)
          + bkv_ref[0]).astype(cdt)
    k = kv[:, :d].reshape(tb, n, d)
    v = kv[:, d:].reshape(tb, n, d)

    # Heads-batched attention via the block-diagonal Q: row c = h*S + s of
    # q_blk carries q[s] only on head h's lanes, so one einsum produces every
    # head's scores at once (no per-head lane slices of Q/K/V).
    qb = jnp.broadcast_to(q_blk_ref[...][None], (tb, hs, d))        # (TB,HS,D)
    scores = jnp.einsum("bcd,bnd->bcn", qb, k,
                        preferred_element_type=jnp.float32)         # (TB,HS,N)
    scores = scores - jnp.max(scores, axis=-1, keepdims=True)
    p = jnp.exp(scores)                                             # f32
    inv = pl.reciprocal(jnp.sum(p, axis=-1, keepdims=True), approx=approx)
    a = (p * inv).astype(cdt)                                       # (TB,HS,N)
    ctx = jnp.einsum("bcn,bnd->bcd", a, v,
                     preferred_element_type=jnp.float32)            # (TB,HS,D)
    # Keep only head h's lanes for rows h*S..h*S+S-1, then collapse the H row
    # groups with cheap sublane slices (lanes are disjoint across heads).
    ctx = ctx * mask_ref[...][None]
    o = ctx[:, 0:s_len, :]
    for h in range(1, num_heads):
        o = o + ctx[:, h * s_len:(h + 1) * s_len, :]
    o = o + q_res_ref[...][None]                                    # (TB,S,D) f32

    # Output projection + residual ReLU:  O + relu(O @ Wo + bo)
    o2d = o.reshape(tb * s_len, d)
    proj = (jnp.dot(o2d.astype(cdt), wo_ref[...],
                    preferred_element_type=jnp.float32) + bo_ref[0])
    out = o2d + jnp.maximum(proj, 0.0)
    # TODO(synk): a lane-dense (TB, S*D) store needs a sublane->lane merging
    # reshape that Mosaic does not reliably lower for D < 128; the output
    # keeps the caller-visible (TB, S, D) layout instead.
    o_ref[...] = out.reshape(tb, s_len, d).astype(o_ref.dtype)


def _tpu_vmem_and_megacore():
    """Best-effort (VMEM capacity, has-2-TensorCores) query with safe fallbacks."""
    vmem = 64 << 20                       # conservative default (v7x per-TC)
    try:
        vmem = int(pltpu.get_tpu_info().vmem_capacity_bytes)
    except Exception:
        pass
    two_tc = False
    try:
        kind = jax.devices()[0].device_kind.lower()
        two_tc = ("v7" in kind) or ("7x" in kind)
    except Exception:
        pass
    if two_tc:                            # v7x: 64 MiB per TensorCore
        vmem = min(vmem, 64 << 20)
    return vmem, two_tc


def _vmem_estimate(tb, n, d, s, h, it):
    """Generous per-grid-step VMEM footprint estimate (bytes), incl. temps."""
    f = 4
    hs = h * s
    x_tiles = 2 * tb * n * d * it                       # double-buffered X
    out_tiles = 2 * tb * s * d * f                      # double-buffered out
    weights = 2 * (d * 2 * d * it + 2 * d * f           # wkv, bkv
                   + d * d * it + d * f                 # wo, bo
                   + s * d * f + hs * d * (it + f))     # q_res, q_blk, mask
    inter = (tb * n * d * it                            # x2d copy
             + tb * n * 2 * d * (f + it)                # kv f32 + cdt
             + 2 * tb * n * d * it                      # k, v
             + tb * hs * d * it                         # q broadcast
             + tb * hs * n * (2 * f + it)               # scores, p, a
             + 2 * tb * hs * d * f                      # ctx, masked ctx
             + tb * s * d * (4 * f + it))               # o, o2d(+cast), proj, out
    return x_tiles + out_tiles + weights + inter


def _pick_block_b(batch, n, d, s, h, it, budget_bytes, prefer_multi_grid):
    """Largest batch tile fitting the VMEM budget; on 2-TC chips prefer an
    even grid length >= 2 so the parallel batch axis splits across cores."""
    divs = [t for t in range(1, batch + 1) if batch % t == 0]
    fits = [t for t in divs if _vmem_estimate(t, n, d, s, h, it) <= budget_bytes]
    if not fits:
        return 1
    if prefer_multi_grid and batch > 1:
        even = [t for t in fits if (batch // t) % 2 == 0]
        if even:
            return max(even)
        multi = [t for t in fits if batch // t >= 2]
        if multi:
            return max(multi)
    return max(fits)


def pma_forward(x, s_param, params, *, num_heads, block_b=None,
                compute_dtype=jnp.bfloat16):
    """PMA forward: MAB(S.repeat(B,1,1), X), ln=False.

    x: (B, N, D) f32; s_param: (1, S, D) f32; params: torch-layout weights
    wq/wk/wv/wo (D, D) and biases bq/bk/bv/bo (D,).
    """
    B, N, D = x.shape
    _, S, _ = s_param.shape
    assert D % num_heads == 0
    ds = D // num_heads
    HS = num_heads * S
    f32 = jnp.float32

    def wT(name):                      # torch (out, in) -> (in, out)
        return jnp.asarray(params[name], f32).T

    # Hoisted, batch-invariant Q projection (seeds shared across the batch).
    q_res = jnp.asarray(s_param[0], f32) @ wT("wq") + jnp.asarray(params["bq"], f32)

    # Block-diagonal head mask and masked/scaled Q of shape (H*S, D).
    # Scale is 1/sqrt(dim_V) = 1/sqrt(D) (full dim), matching the PyTorch PMA.
    row_head = (jnp.arange(HS) // S)[:, None]
    col_head = (jnp.arange(D) // ds)[None, :]
    mask = (row_head == col_head).astype(f32)                       # (H*S, D)
    q_blk = (jnp.tile(q_res * (1.0 / math.sqrt(D)), (num_heads, 1))
             * mask).astype(compute_dtype)

    wkv = jnp.concatenate([wT("wk"), wT("wv")], axis=1).astype(compute_dtype)
    bkv = jnp.concatenate([jnp.asarray(params["bk"], f32),
                           jnp.asarray(params["bv"], f32)]).reshape(1, 2 * D)
    wo = wT("wo").astype(compute_dtype)
    bo = jnp.asarray(params["bo"], f32).reshape(1, D)
    x_c = x.astype(compute_dtype)

    it = jnp.dtype(compute_dtype).itemsize
    vmem_cap, two_tc = _tpu_vmem_and_megacore()
    if block_b is None:
        block_b = _pick_block_b(B, N, D, S, num_heads, it,
                                budget_bytes=vmem_cap // 2,
                                prefer_multi_grid=two_tc)
    assert B % block_b == 0, "block_b must divide the batch"
    grid = (B // block_b,)

    est = _vmem_estimate(block_b, N, D, S, num_heads, it)
    headroom = (8 << 20) if vmem_cap <= (64 << 20) else (28 << 20)
    vmem_limit = int(min(vmem_cap - headroom, max(32 << 20, 2 * est)))

    flops = int(2 * B * N * D * (2 * D)          # fused K/V projection
                + 2 * B * S * D * D              # output projection
                + 2 * B * HS * N * D * 2)        # scores + A@V (heads-batched)
    cost = pl.CostEstimate(
        flops=flops,
        transcendentals=int(B * HS * N + B * HS),
        bytes_accessed=int(B * N * D * it + B * S * D * 4
                           + 3 * D * D * it + 3 * D * 4
                           + S * D * 4 + HS * D * (it + 4)))

    const2 = lambda i: (0, 0)
    return pl.pallas_call(
        _pma_kernel,
        out_shape=jax.ShapeDtypeStruct((B, S, D), jnp.float32),
        grid=grid,
        in_specs=[
            pl.BlockSpec((S, D), const2),                         # q residual
            pl.BlockSpec((HS, D), const2),                        # block-diag Q
            pl.BlockSpec((HS, D), const2),                        # head mask
            pl.BlockSpec((block_b, N, D), lambda i: (i, 0, 0)),   # X batch tile
            pl.BlockSpec((D, 2 * D), const2),                     # Wkv
            pl.BlockSpec((1, 2 * D), const2),                     # bkv
            pl.BlockSpec((D, D), const2),                         # Wo
            pl.BlockSpec((1, D), const2),                         # bo
        ],
        out_specs=pl.BlockSpec((block_b, S, D), lambda i: (i, 0, 0)),
        compiler_params=pltpu.CompilerParams(
            dimension_semantics=("parallel",),
            vmem_limit_bytes=vmem_limit),
        cost_estimate=cost,
    )(q_res, q_blk, mask, x_c, wkv, bkv, wo, bo)


def pma_reference(x, s_param, params, *, num_heads):
    """Pure-JAX (f32) reference mirroring the PyTorch MAB/PMA forward."""
    B, N, D = x.shape
    S = s_param.shape[1]
    s = jnp.broadcast_to(s_param, (B, S, D))
    q = s @ jnp.asarray(params["wq"]).T + params["bq"]
    k = x @ jnp.asarray(params["wk"]).T + params["bk"]
    v = x @ jnp.asarray(params["wv"]).T + params["bv"]
    ds = D // num_heads

    def split_heads(t):   # torch.cat(split(ds, 2), 0): head -> outer batch
        return jnp.concatenate(
            [t[..., h * ds:(h + 1) * ds] for h in range(num_heads)], axis=0)

    q_, k_, v_ = split_heads(q), split_heads(k), split_heads(v)
    a = jax.nn.softmax(jnp.einsum("bsd,bnd->bsn", q_, k_) / math.sqrt(D), axis=-1)
    o_ = q_ + jnp.einsum("bsn,bnd->bsd", a, v_)
    o = jnp.concatenate([o_[h * B:(h + 1) * B] for h in range(num_heads)], axis=-1)
    return o + jax.nn.relu(o @ jnp.asarray(params["wo"]).T + params["bo"])


if __name__ == "__main__":
    B, N, D = 8, 16, 32          # batch, set size, dim
    num_heads, num_seeds = 4, 4

    key = jax.random.PRNGKey(0)
    keys = jax.random.split(key, 10)

    # Xavier-uniform seeds S: shape (1, num_seeds, dim)
    limit_s = math.sqrt(6.0 / (num_seeds + D))
    s_param = jax.random.uniform(keys[0], (1, num_seeds, D), jnp.float32,
                                 minval=-limit_s, maxval=limit_s)

    def linear_init(kw, kb, out_dim, in_dim):
        lim = 1.0 / math.sqrt(in_dim)
        w = jax.random.uniform(kw, (out_dim, in_dim), jnp.float32, -lim, lim)
        b = jax.random.uniform(kb, (out_dim,), jnp.float32, -lim, lim)
        return w, b

    wq, bq = linear_init(keys[1], keys[2], D, D)
    wk, bk = linear_init(keys[3], keys[4], D, D)
    wv, bv = linear_init(keys[5], keys[6], D, D)
    wo, bo = linear_init(keys[7], keys[8], D, D)
    params = dict(wq=wq, bq=bq, wk=wk, bk=bk, wv=wv, bv=bv, wo=wo, bo=bo)

    x = jax.random.normal(keys[9], (B, N, D), jnp.float32)

    ref = pma_reference(x, s_param, params, num_heads=num_heads)

    # f32 compute path: tight structural check (exact reciprocal on this path).
    out_f32 = jax.block_until_ready(
        pma_forward(x, s_param, params, num_heads=num_heads,
                    compute_dtype=jnp.float32))
    assert out_f32.shape == (B, num_seeds, D)
    assert jnp.allclose(out_f32, ref, atol=1e-3, rtol=1e-3), "f32 kernel mismatch"

    # bf16 MXU path (default): looser tolerance for operand rounding.
    out_bf16 = jax.block_until_ready(
        pma_forward(x, s_param, params, num_heads=num_heads))
    assert out_bf16.shape == (B, num_seeds, D)
    assert jnp.allclose(out_bf16, ref, atol=3e-2, rtol=3e-2), "bf16 kernel mismatch"

    print("KERNEL_OK")
</pallas_src>

<mosaic_0001>
module attributes {stable_mosaic.version = 11 : i64} {
  func.func @_pma_kernel(%arg0: i32, %arg1: memref<4x32xf32, #tpu.memory_space<vmem>>, %arg2: memref<16x32xf32, #tpu.memory_space<vmem>>, %arg3: memref<16x32xf32, #tpu.memory_space<vmem>>, %arg4: memref<8x16x32xf32, #tpu.memory_space<vmem>>, %arg5: memref<32x64xf32, #tpu.memory_space<vmem>>, %arg6: memref<1x64xf32, #tpu.memory_space<vmem>>, %arg7: memref<32x32xf32, #tpu.memory_space<vmem>>, %arg8: memref<1x32xf32, #tpu.memory_space<vmem>>, %arg9: memref<8x4x32xf32, #tpu.memory_space<vmem>>) attributes {dimension_semantics = [#tpu.dimension_semantics<parallel>], iteration_bounds = array<i64: 1>, scalar_prefetch = 0 : i64, scratch_operands = 0 : i64, tpu.core_type = #tpu.core_type<tc>, window_params = [{pipeline_mode = #tpu.pipeline_mode<synchronous>, transform_indices = @transform_0, window_bounds = array<i64: 4, 32>}, {pipeline_mode = #tpu.pipeline_mode<synchronous>, transform_indices = @transform_1, window_bounds = array<i64: 16, 32>}, {pipeline_mode = #tpu.pipeline_mode<synchronous>, transform_indices = @transform_2, window_bounds = array<i64: 16, 32>}, {transform_indices = @transform_3, window_bounds = array<i64: 8, 16, 32>}, {pipeline_mode = #tpu.pipeline_mode<synchronous>, transform_indices = @transform_4, window_bounds = array<i64: 32, 64>}, {pipeline_mode = #tpu.pipeline_mode<synchronous>, transform_indices = @transform_5, window_bounds = array<i64: 1, 64>}, {pipeline_mode = #tpu.pipeline_mode<synchronous>, transform_indices = @transform_6, window_bounds = array<i64: 32, 32>}, {pipeline_mode = #tpu.pipeline_mode<synchronous>, transform_indices = @transform_7, window_bounds = array<i64: 1, 32>}, {transform_indices = @transform_8, window_bounds = array<i64: 8, 4, 32>}]} {
    %c0 = arith.constant 0 : index
    %c0_0 = arith.constant 0 : index
    %c0_1 = arith.constant 0 : index
    %0 = vector.load %arg4[%c0, %c0_0, %c0_1] : memref<8x16x32xf32, #tpu.memory_space<vmem>>, vector<8x16x32xf32>
    %1 = vector.shape_cast %0 : vector<8x16x32xf32> to vector<128x32xf32>
    %c0_2 = arith.constant 0 : index
    %c0_3 = arith.constant 0 : index
    %2 = vector.load %arg5[%c0_2, %c0_3] : memref<32x64xf32, #tpu.memory_space<vmem>>, vector<32x64xf32>
    %cst = arith.constant dense<0.000000e+00> : vector<128x64xf32>
    %3 = tpu.matmul %1, %2, %cst {dimension_numbers = #tpu.dot_dimension_numbers<[1], [0], [0], [1], [0, 0, 1, 1], [], []>} : vector<128x32xf32>, vector<32x64xf32>, vector<128x64xf32> -> vector<128x64xf32>
    %c0_4 = arith.constant 0 : index
    %c0_5 = arith.constant 0 : index
    %4 = vector.load %arg6[%c0_4, %c0_5] : memref<1x64xf32, #tpu.memory_space<vmem>>, vector<1x64xf32>
    %5 = vector.shape_cast %4 : vector<1x64xf32> to vector<64xf32>
    %6 = vector.shape_cast %5 : vector<64xf32> to vector<1x64xf32>
    %7 = vector.broadcast %6 : vector<1x64xf32> to vector<128x64xf32>
    %8 = arith.addf %3, %7 : vector<128x64xf32>
    %9 = vector.extract_strided_slice %8 {offsets = [0, 0], sizes = [128, 32], strides = [1, 1]} : vector<128x64xf32> to vector<128x32xf32>
    %10 = vector.shape_cast %9 : vector<128x32xf32> to vector<8x16x32xf32>
    %11 = vector.extract_strided_slice %8 {offsets = [0, 32], sizes = [128, 32], strides = [1, 1]} : vector<128x64xf32> to vector<128x32xf32>
    %12 = vector.shape_cast %11 : vector<128x32xf32> to vector<8x16x32xf32>
    %c0_6 = arith.constant 0 : index
    %c0_7 = arith.constant 0 : index
    %13 = vector.load %arg2[%c0_6, %c0_7] : memref<16x32xf32, #tpu.memory_space<vmem>>, vector<16x32xf32>
    %14 = vector.shape_cast %13 : vector<16x32xf32> to vector<1x16x32xf32>
    %15 = vector.shape_cast %14 : vector<1x16x32xf32> to vector<1x16x32xf32>
    %16 = vector.broadcast %15 : vector<1x16x32xf32> to vector<8x16x32xf32>
    "tpu.trace_start"() <{level = 10 : i32, message = "bcd,bnd->bcn"}> : () -> ()
    %cst_8 = arith.constant dense<0.000000e+00> : vector<8x16x16xf32>
    %17 = tpu.matmul %16, %10, %cst_8 {dimension_numbers = #tpu.dot_dimension_numbers<[2], [2], [1], [1], [0, 0, 0, 1, 1, 1], [0], [0]>} : vector<8x16x32xf32>, vector<8x16x32xf32>, vector<8x16x16xf32> -> vector<8x16x16xf32>
    "tpu.trace_stop"() : () -> ()
    %cst_9 = arith.constant dense<0xFF800000> : vector<8x16xf32>
    %18 = vector.multi_reduction <maximumf>, %17, %cst_9 [2] : vector<8x16x16xf32> to vector<8x16xf32>
    %19 = vector.shape_cast %18 : vector<8x16xf32> to vector<8x16x1xf32>
    %20 = vector.broadcast %19 : vector<8x16x1xf32> to vector<8x16x16xf32>
    %21 = arith.subf %17, %20 : vector<8x16x16xf32>
    %22 = math.exp %21 : vector<8x16x16xf32>
    %cst_10 = arith.constant dense<0.000000e+00> : vector<8x16xf32>
    %23 = vector.multi_reduction <add>, %22, %cst_10 [2] : vector<8x16x16xf32> to vector<8x16xf32>
    %24 = vector.shape_cast %23 : vector<8x16xf32> to vector<8x16x1xf32>
    %25 = tpu.reciprocal %24 : vector<8x16x1xf32> -> vector<8x16x1xf32>
    %26 = vector.broadcast %25 : vector<8x16x1xf32> to vector<8x16x16xf32>
    %27 = arith.mulf %22, %26 : vector<8x16x16xf32>
    "tpu.trace_start"() <{level = 10 : i32, message = "bcn,bnd->bcd"}> : () -> ()
    %cst_11 = arith.constant dense<0.000000e+00> : vector<8x16x32xf32>
    %28 = tpu.matmul %27, %12, %cst_11 {dimension_numbers = #tpu.dot_dimension_numbers<[2], [1], [1], [2], [0, 0, 0, 1, 1, 2], [0], [0]>} : vector<8x16x16xf32>, vector<8x16x32xf32>, vector<8x16x32xf32> -> vector<8x16x32xf32>
    "tpu.trace_stop"() : () -> ()
    %c0_12 = arith.constant 0 : index
    %c0_13 = arith.constant 0 : index
    %29 = vector.load %arg3[%c0_12, %c0_13] : memref<16x32xf32, #tpu.memory_space<vmem>>, vector<16x32xf32>
    %30 = vector.shape_cast %29 : vector<16x32xf32> to vector<1x16x32xf32>
    %31 = vector.broadcast %30 : vector<1x16x32xf32> to vector<8x16x32xf32>
    %32 = arith.mulf %28, %31 : vector<8x16x32xf32>
    %33 = vector.extract_strided_slice %32 {offsets = [0, 0, 0], sizes = [8, 4, 32], strides = [1, 1, 1]} : vector<8x16x32xf32> to vector<8x4x32xf32>
    %34 = vector.extract_strided_slice %32 {offsets = [0, 4, 0], sizes = [8, 4, 32], strides = [1, 1, 1]} : vector<8x16x32xf32> to vector<8x4x32xf32>
    %35 = arith.addf %33, %34 : vector<8x4x32xf32>
    %36 = vector.extract_strided_slice %32 {offsets = [0, 8, 0], sizes = [8, 4, 32], strides = [1, 1, 1]} : vector<8x16x32xf32> to vector<8x4x32xf32>
    %37 = arith.addf %35, %36 : vector<8x4x32xf32>
    %38 = vector.extract_strided_slice %32 {offsets = [0, 12, 0], sizes = [8, 4, 32], strides = [1, 1, 1]} : vector<8x16x32xf32> to vector<8x4x32xf32>
    %39 = arith.addf %37, %38 : vector<8x4x32xf32>
    %c0_14 = arith.constant 0 : index
    %c0_15 = arith.constant 0 : index
    %40 = vector.load %arg1[%c0_14, %c0_15] : memref<4x32xf32, #tpu.memory_space<vmem>>, vector<4x32xf32>
    %41 = vector.shape_cast %40 : vector<4x32xf32> to vector<1x4x32xf32>
    %42 = vector.broadcast %41 : vector<1x4x32xf32> to vector<8x4x32xf32>
    %43 = arith.addf %39, %42 : vector<8x4x32xf32>
    %44 = vector.shape_cast %43 : vector<8x4x32xf32> to vector<32x32xf32>
    %c0_16 = arith.constant 0 : index
    %c0_17 = arith.constant 0 : index
    %45 = vector.load %arg7[%c0_16, %c0_17] : memref<32x32xf32, #tpu.memory_space<vmem>>, vector<32x32xf32>
    %cst_18 = arith.constant dense<0.000000e+00> : vector<32x32xf32>
    %46 = tpu.matmul %44, %45, %cst_18 {dimension_numbers = #tpu.dot_dimension_numbers<[1], [0], [0], [1], [0, 0, 1, 1], [], []>} : vector<32x32xf32>, vector<32x32xf32>, vector<32x32xf32> -> vector<32x32xf32>
    %c0_19 = arith.constant 0 : index
    %c0_20 = arith.constant 0 : index
    %47 = vector.load %arg8[%c0_19, %c0_20] : memref<1x32xf32, #tpu.memory_space<vmem>>, vector<1x32xf32>
    %48 = vector.shape_cast %47 : vector<1x32xf32> to vector<32xf32>
    %49 = vector.shape_cast %48 : vector<32xf32> to vector<1x32xf32>
    %50 = vector.broadcast %49 : vector<1x32xf32> to vector<32x32xf32>
    %51 = arith.addf %46, %50 : vector<32x32xf32>
    %cst_21 = arith.constant 0.000000e+00 : f32
    %52 = vector.broadcast %cst_21 : f32 to vector<32x32xf32>
    %53 = arith.maximumf %51, %52 : vector<32x32xf32>
    %54 = arith.addf %44, %53 : vector<32x32xf32>
    %55 = vector.shape_cast %54 : vector<32x32xf32> to vector<8x4x32xf32>
    %c0_22 = arith.constant 0 : index
    %c0_23 = arith.constant 0 : index
    %c0_24 = arith.constant 0 : index
    %56 = vector.load %arg9[%c0_22, %c0_23, %c0_24] : memref<8x4x32xf32, #tpu.memory_space<vmem>>, vector<8x4x32xf32>
    tpu.vector_store %arg9[%c0_22, %c0_23, %c0_24], %55 {strides = array<i32>} : memref<8x4x32xf32, #tpu.memory_space<vmem>>, vector<8x4x32xf32>,
    return
  }
  func.func @transform_0(%arg0: i32) -> (i32, i32) {
    %c0_i32 = arith.constant 0 : i32
    %c0_i32_0 = arith.constant 0 : i32
    %c0_i32_1 = arith.constant 0 : i32
    return %c0_i32, %c0_i32_0 : i32, i32
  }
  func.func @transform_1(%arg0: i32) -> (i32, i32) {
    %c0_i32 = arith.constant 0 : i32
    %c0_i32_0 = arith.constant 0 : i32
    %c0_i32_1 = arith.constant 0 : i32
    return %c0_i32, %c0_i32_0 : i32, i32
  }
  func.func @transform_2(%arg0: i32) -> (i32, i32) {
    %c0_i32 = arith.constant 0 : i32
    %c0_i32_0 = arith.constant 0 : i32
    %c0_i32_1 = arith.constant 0 : i32
    return %c0_i32, %c0_i32_0 : i32, i32
  }
  func.func @transform_3(%arg0: i32) -> (i32, i32, i32) {
    %c0_i32 = arith.constant 0 : i32
    %c0_i32_0 = arith.constant 0 : i32
    %c0_i32_1 = arith.constant 0 : i32
    return %arg0, %c0_i32, %c0_i32_0 : i32, i32, i32
  }
  func.func @transform_4(%arg0: i32) -> (i32, i32) {
    %c0_i32 = arith.constant 0 : i32
    %c0_i32_0 = arith.constant 0 : i32
    %c0_i32_1 = arith.constant 0 : i32
    return %c0_i32, %c0_i32_0 : i32, i32
  }
  func.func @transform_5(%arg0: i32) -> (i32, i32) {
    %c0_i32 = arith.constant 0 : i32
    %c0_i32_0 = arith.constant 0 : i32
    %c0_i32_1 = arith.constant 0 : i32
    return %c0_i32, %c0_i32_0 : i32, i32
  }
  func.func @transform_6(%arg0: i32) -> (i32, i32) {
    %c0_i32 = arith.constant 0 : i32
    %c0_i32_0 = arith.constant 0 : i32
    %c0_i32_1 = arith.constant 0 : i32
    return %c0_i32, %c0_i32_0 : i32, i32
  }
  func.func @transform_7(%arg0: i32) -> (i32, i32) {
    %c0_i32 = arith.constant 0 : i32
    %c0_i32_0 = arith.constant 0 : i32
    %c0_i32_1 = arith.constant 0 : i32
    return %c0_i32, %c0_i32_0 : i32, i32
  }
  func.func @transform_8(%arg0: i32) -> (i32, i32, i32) {
    %c0_i32 = arith.constant 0 : i32
    %c0_i32_0 = arith.constant 0 : i32
    %c0_i32_1 = arith.constant 0 : i32
    return %arg0, %c0_i32, %c0_i32_0 : i32, i32, i32
  }
}

</mosaic_0001>

<bundles_post_ra>
// kernel: tpu_custom_call.1
= control target key start
LH: loop header
LB: loop body
LE: loop exit
PB: predicated region body
PF: predicated region fallthrough
CT: control target
= control target key end

     0   :  { %13 = vsyncpa [#allocation3], 0  ;;  %s3376_s0 = inlined_call_operand.hbm [shape: f32[4,32], index: 0, kind: input, shape index: {}]   ;;  %s3377_s1 = inlined_call_operand.hbm [shape: f32[16,32], index: 1, kind: input, shape index: {}]   ;;  %s3378_s2 = inlined_call_operand.hbm [shape: f32[16,32], index: 2, kind: input, shape index: {}]   ;;  %s3379_s3 = inlined_call_operand.hbm [shape: f32[8,16,32], index: 3, kind: input, shape index: {}]   ;;  %s3380_s4 = inlined_call_operand.hbm [shape: f32[32,64], index: 4, kind: input, shape index: {}]   ;;  %s3381_s5 = inlined_call_operand.vmem [shape: f32[1,64], index: 5, kind: input, shape index: {}]   ;;  %s3382_s6 = inlined_call_operand.hbm [shape: f32[32,32], index: 6, kind: input, shape index: {}]   ;;  %s3383_s7 = inlined_call_operand.vmem [shape: f32[1,32], index: 7, kind: input, shape index: {}]   ;;  %s3384_s8 = inlined_call_operand.hbm [shape: f32[8,4,32], index: 8, kind: output, shape index: {}]  }
   0x1   :  { %14 = vsyncpa [#allocation6], 0 }
   0x2   :  { %15 = vsyncpa [#allocation9], 0 }
   0x3   :  { %16 = vsyncpa [#allocation12], 0 }
   0x4   :  { %17 = vsyncpa [#allocation4], 0  ;;  %s2824_s27 = smov [#allocation5]   ;;  %s2660_s9 = scalar_lea.hbm %s3377_s1, 256 }
   0x5   :  { %s33_s28 = sshll.u32 %s2824_s27, 4  ;;  %p2661_p0 = scmp.ne.s32.totalorder %s3377_s1, %s2660_s9  ;;  %s34_s28 = int_to_ptr.vmem [resolvable:$true] %s33_s28 }
   0x6   :  { %p2664_p1 = scmp.lt.u32.totalorder %s2660_s9, %s3377_s1 }
   0x8   :  { %p2666_p2 = pnand %p2664_p1, %p2661_p0 }
   0xa   :  { %2669 = shalt.err (!%p2666_p2)
}
   0xb   :  { %s2670_s14 = scalar_lea.vmem %s34_s28, 256  ;;  %p2675_p4 = scmp.lt.s32.totalorder %s34_s28, %s34_s28 }
   0xc   :  { %p2671_p3 = scmp.ne.s32.totalorder %s34_s28, %s2670_s14  ;;  %p2676_p5 = scmp.lt.s32.totalorder %s2670_s14, %s2670_s14 }
   0xe   :  { %p2677_p6 = por %p2676_p5, %p2675_p4 }
  0x10   :  { %p2678_p7 = pnand %p2677_p6, %p2671_p3 }
  0x12   :  { %2681 = shalt.err (!%p2678_p7)
}
  0x13   :  { %s2825_s15 = smov 128   ;;  %s2826_s16 = smov 8  }
  0x14   :  { %39 = dma.hbm_to_vmem [thread:$0]  %s3377_s1, 256, %s34_s28, [#allocation6], %s2825_s15, %s2825_s15, %s2826_s16  }
  0x15   :  { %s2827_s19 = smov [#allocation8]   ;;  %s2828_s21 = smov [#allocation2]  }
  0x16   :  { %s57_s20 = sshll.u32 %s2827_s19, 4  ;;  %s24_s22 = sshll.u32 %s2828_s21, 4  ;;  %s58_s20 = int_to_ptr.vmem [resolvable:$true] %s57_s20  ;;  %s25_s22 = int_to_ptr.vmem [resolvable:$true] %s24_s22 }
  0x17   :  { %s2682_s25 = scalar_lea.hbm %s3379_s3, 2048 }
  0x18   :  { %p2683_p8 = scmp.ne.s32.totalorder %s3379_s3, %s2682_s25  ;;  %p2686_p9 = scmp.lt.u32.totalorder %s2682_s25, %s3379_s3 }
  0x1a   :  { %p2688_p10 = pnand %p2686_p9, %p2683_p8 }
  0x1c   :  { %2691 = shalt.err (!%p2688_p10)
}
  0x1d   :  { %s2692_s1 = scalar_lea.vmem %s58_s20, 2048  ;;  %p2697_p12 = scmp.lt.s32.totalorder %s58_s20, %s58_s20 }
  0x1e   :  { %p2693_p11 = scmp.ne.s32.totalorder %s58_s20, %s2692_s1  ;;  %p2698_p13 = scmp.lt.s32.totalorder %s2692_s1, %s2692_s1 }
  0x20   :  { %p2699_p0 = por %p2698_p13, %p2697_p12 }
  0x22   :  { %p2700_p1 = pnand %p2699_p0, %p2693_p11 }
  0x24   :  { %2703 = shalt.err (!%p2700_p1)
}
  0x25   :  { %63 = dma.hbm_to_vmem [thread:$0]  %s3379_s3, 2048, %s58_s20, [#allocation9], %s2825_s15, %s2825_s15, %s2826_s16  }
  0x26   :  { %s2704_s12 = scalar_lea.hbm %s3376_s0, 64 }
  0x27   :  { %p2705_p2 = scmp.ne.s32.totalorder %s3376_s0, %s2704_s12  ;;  %p2708_p3 = scmp.lt.u32.totalorder %s2704_s12, %s3376_s0 }
  0x29   :  { %p2710_p4 = pnand %p2708_p3, %p2705_p2 }
  0x2b   :  { %2713 = shalt.err (!%p2710_p4)
}
  0x2c   :  { %s2714_s19 = scalar_lea.vmem %s25_s22, 64  ;;  %p2719_p6 = scmp.lt.s32.totalorder %s25_s22, %s25_s22 }
  0x2d   :  { %p2715_p5 = scmp.ne.s32.totalorder %s25_s22, %s2714_s19  ;;  %p2720_p7 = scmp.lt.s32.totalorder %s2714_s19, %s2714_s19 }
  0x2f   :  { %p2721_p8 = por %p2720_p7, %p2719_p6 }
  0x31   :  { %p2722_p9 = pnand %p2721_p8, %p2715_p5 }
  0x33   :  { %2725 = shalt.err (!%p2722_p9)
}
  0x34   :  { %27 = dma.hbm_to_vmem [thread:$0]  %s3376_s0, 64, %s25_s22, [#allocation3]  }
  0x35   :  { %s2829_s21 = smov [#allocation7]   ;;  %s2830_s24 = smov [#allocation10]  }
  0x36   :  { %s45_s23 = sshll.u32 %s2829_s21, 4  ;;  %s69_s25 = sshll.u32 %s2830_s24, 4  ;;  %s46_s23 = int_to_ptr.vmem [resolvable:$true] %s45_s23  ;;  %s70_s25 = int_to_ptr.vmem [resolvable:$true] %s69_s25 }
  0x37   :  { %s2726_s29 = scalar_lea.hbm %s3378_s2, 256 }
  0x38   :  { %p2727_p10 = scmp.ne.s32.totalorder %s3378_s2, %s2726_s29  ;;  %p2730_p11 = scmp.lt.u32.totalorder %s2726_s29, %s3378_s2 }
  0x3a   :  { %p2732_p12 = pnand %p2730_p11, %p2727_p10 }
  0x3c   :  { %2735 = shalt.err (!%p2732_p12)
}
  0x3d   :  { %s2736_s0 = scalar_lea.vmem %s46_s23, 256  ;;  %p2741_p0 = scmp.lt.s32.totalorder %s46_s23, %s46_s23 }
  0x3e   :  { %p2737_p13 = scmp.ne.s32.totalorder %s46_s23, %s2736_s0  ;;  %p2742_p1 = scmp.lt.s32.totalorder %s2736_s0, %s2736_s0 }
  0x40   :  { %p2743_p2 = por %p2742_p1, %p2741_p0 }
  0x42   :  { %p2744_p3 = pnand %p2743_p2, %p2737_p13 }
  0x44   :  { %2747 = shalt.err (!%p2744_p3)
}
  0x45   :  { %51 = dma.hbm_to_vmem [thread:$0]  %s3378_s2, 256, %s46_s23, [#allocation6], %s2825_s15, %s2825_s15, %s2826_s16  }
  0x46   :  { %s2748_s13 = scalar_lea.hbm %s3380_s4, 512 }
  0x47   :  { %p2749_p4 = scmp.ne.s32.totalorder %s3380_s4, %s2748_s13  ;;  %p2752_p5 = scmp.lt.u32.totalorder %s2748_s13, %s3380_s4 }
  0x49   :  { %p2754_p6 = pnand %p2752_p5, %p2749_p4 }
  0x4b   :  { %2757 = shalt.err (!%p2754_p6)
}
  0x4c   :  { %s2758_s3 = scalar_lea.vmem %s70_s25, 512  ;;  %p2763_p8 = scmp.lt.s32.totalorder %s70_s25, %s70_s25 }
  0x4d   :  { %p2759_p7 = scmp.ne.s32.totalorder %s70_s25, %s2758_s3  ;;  %p2764_p9 = scmp.lt.s32.totalorder %s2758_s3, %s2758_s3 }
  0x4f   :  { %p2765_p10 = por %p2764_p9, %p2763_p8 }
  0x51   :  { %p2766_p11 = pnand %p2765_p10, %p2759_p7 }
  0x53   :  { %2769 = shalt.err (!%p2766_p11)
}
  0x54   :  { %75 = dma.hbm_to_vmem [thread:$0]  %s3380_s4, 512, %s70_s25, [#allocation9], %s2825_s15, %s2825_s15, %s2826_s16  }
  0x55   :  { %s2831_s21 = smov [#allocation11]   ;;  %s2770_s27 = scalar_lea.hbm %s3382_s6, 512 }
  0x56   :  { %s83_s23 = sshll.u32 %s2831_s21, 4  ;;  %p2771_p12 = scmp.ne.s32.totalorder %s3382_s6, %s2770_s27  ;;  %s84_s23 = int_to_ptr.vmem [resolvable:$true] %s83_s23 }
  0x57   :  { %p2774_p13 = scmp.lt.u32.totalorder %s2770_s27, %s3382_s6 }
  0x59   :  { %p2776_p0 = pnand %p2774_p13, %p2771_p12 }
  0x5b   :  { %2779 = shalt.err (!%p2776_p0)
}
  0x5c   :  { %s2780_s9 = scalar_lea.vmem %s84_s23, 512  ;;  %p2785_p2 = scmp.lt.s32.totalorder %s84_s23, %s84_s23 }
  0x5d   :  { %p2781_p1 = scmp.ne.s32.totalorder %s84_s23, %s2780_s9  ;;  %p2786_p3 = scmp.lt.s32.totalorder %s2780_s9, %s2780_s9 }
  0x5f   :  { %p2787_p4 = por %p2786_p3, %p2785_p2 }
  0x61   :  { %p2788_p5 = pnand %p2787_p4, %p2781_p1 }
  0x63   :  { %2791 = shalt.err (!%p2788_p5)
}
  0x64   :  { %89 = dma.hbm_to_vmem [thread:$0]  %s3382_s6, 512, %s84_s23, [#allocation12], %s2825_s15, %s2825_s15, %s2826_s16  }
  0x65   :  { %2814 = dma.done.wait [#allocation3], 64  }
  0x66   :  { %2815 = vsyncadd [#allocation3], 4294967232 }
  0x67   :  { %2816 = dma.done.wait [#allocation6], 512  }
  0x68   :  { %2817 = vsyncadd [#allocation6], 4294966784 }
  0x69   :  { %2818 = dma.done.wait [#allocation9], 2560  }
  0x6a   :  { %2819 = vsyncadd [#allocation9], 4294964736 }
  0x6b   :  { %2820 = dma.done.wait [#allocation12], 512  }
  0x6c   :  { %2821 = vsyncadd [#allocation12], 4294966784  ;;  %vm137_vm0 = vcmask 261120   ;;  %v126_v0 = vld [vmem:[#allocation10] sm:$0xff]  ;;  %v127_v1 = vld [vmem:[#allocation10 + $0x8] sm:$0xff]  ;;  %vm987_vm2 = vcmask 130048  }
  0x6d   :  { %v128_v2 = vld [vmem:[#allocation10 + $0x10] sm:$0xff]  ;;  %v2448_v3 = vpack.c.bf16 %v127_v1, %v126_v0  ;;  %v129_v4 = vld [vmem:[#allocation10 + $0x18] sm:$0xff]  ;;  %v110_v5 = vld [vmem:[#allocation8] sm:$0xff]  ;;  %vm2099_vm3 = vcmask 257024  }
  0x6e   :  { %v2452_v6 = vpack.c.bf16 %v129_v4, %v128_v2  ;;  %2298 = vmatprep.mubr.msk.f32.mxu0 %vm137_vm0, %v110_v5  ;;  %v111_v7 = vld [vmem:[#allocation8 + $0x8] sm:$0xff]  ;;  %v112_v8 = vld [vmem:[#allocation8 + $0x10] sm:$0xff]  ;;  %v113_v9 = vld [vmem:[#allocation8 + $0x18] sm:$0xff] }
  0x6f   :  { %2449 = vmatprep.subr.bf16.mxu0 %v2448_v3  ;;  %v114_v10 = vld [vmem:[#allocation8 + $0x20] sm:$0xff]  ;;  %v115_v11 = vld [vmem:[#allocation8 + $0x28] sm:$0xff]  ;;  %v116_v12 = vld [vmem:[#allocation8 + $0x30] sm:$0xff] }
  0x70   :  { %2451 = vmatpush3.bf16.msra.mxu0 %v2448_v3  ;;  %v117_v13 = vld [vmem:[#allocation8 + $0x38] sm:$0xff]  ;;  %v118_v14 = vld [vmem:[#allocation8 + $0x40] sm:$0xff]  ;;  %v119_v15 = vld [vmem:[#allocation8 + $0x48] sm:$0xff] }
  0x71   :  { %2453 = vmatprep.subr.bf16.mxu0 %v2452_v6  ;;  %v120_v16 = vld [vmem:[#allocation8 + $0x50] sm:$0xff]  ;;  %v121_v17 = vld [vmem:[#allocation8 + $0x58] sm:$0xff]  ;;  %v122_v18 = vld [vmem:[#allocation8 + $0x60] sm:$0xff] }
  0x72   :  { %v123_v19 = vld [vmem:[#allocation8 + $0x68] sm:$0xff]  ;;  %v124_v20 = vld [vmem:[#allocation8 + $0x70] sm:$0xff]  ;;  %v125_v21 = vld [vmem:[#allocation8 + $0x78] sm:$0xff] }
  0x73   :  { %v2984_v22 = vld [vmem:[#allocation5] sm:$0xff]  ;;  %v2128_v23 = vld [vmem:[%s3381_s5] ss:$0 sm:$0xff]  ;;  %vm2999_vm1 = vmpackc.low %vm137_vm0, %vm137_vm0  ;;  %s2832_s5 = smov 96  }
  0x74   :  { %2455 = vmatpush3.bf16.msra.mxu0 %v2452_v6  ;;  %2326 = vmatprep.mubr.msk.f32.mxu1 %vm137_vm0, %v2984_v22  ;;  %v332_v41 = vld [vmem:[#allocation5 + $0x8] sm:$0xff] }
  0x77   :  { %2299 = vmatmul.mubr.msk.f32.vlgmr.msra.gmra.mrb[0].mxu0 %vm137_vm0, %v111_v7 }
  0x78   :  { %2301 = vmatprep.mubr.msk.f32.mxu0 %vm137_vm0, %v112_v8 }
  0x7b   :  { %2302 = vmatmul.mubr.msk.f32.gmra.mrb[2].mxu0 %vm137_vm0, %v113_v9 }
  0x7c   :  { %2304 = vmatprep.mubr.msk.f32.mxu0 %vm137_vm0, %v114_v10 }
  0x7f   :  { %2305 = vmatmul.mubr.msk.f32.gmra.mrb[4].mxu0 %vm137_vm0, %v115_v11 }
  0x80   :  { %2307 = vmatprep.mubr.msk.f32.mxu0 %vm137_vm0, %v116_v12 }
  0x83   :  { %2308 = vmatmul.mubr.msk.f32.gmra.mrb[6].mxu0 %vm137_vm0, %v117_v13 }
  0x84   :  { %2310 = vmatprep.mubr.msk.f32.mxu0 %vm137_vm0, %v118_v14 }
  0x87   :  { %2311 = vmatmul.mubr.msk.f32.gmra.mrb[8].mxu0 %vm137_vm0, %v119_v15 }
  0x88   :  { %2313 = vmatprep.mubr.msk.f32.mxu0 %vm137_vm0, %v120_v16 }
  0x8b   :  { %2314 = vmatmul.mubr.msk.f32.gmra.mrb[10].mxu0 %vm137_vm0, %v121_v17 }
  0x8c   :  { %2316 = vmatprep.mubr.msk.f32.mxu0 %vm137_vm0, %v122_v18 }
  0x8f   :  { %2317 = vmatmul.mubr.msk.f32.gmra.mrb[12].mxu0 %vm137_vm0, %v123_v19 }
  0x90   :  { %2319 = vmatprep.mubr.msk.f32.mxu0 %vm137_vm0, %v124_v20 }
  0x93   :  { %2320 = vmatmul.mubr.msk.f32.gmra.mrb[14].mxu0 %vm137_vm0, %v125_v21 }
  0x94   :  { %2368 = vmatprep.mubr.msk.f32.mxu0 %vm137_vm0, %v2984_v22 }
 0x14a   :  { %v2300_v24 = vpop.f32.mrb[0].mxu0 }
 0x14b   :  { %v2993_v25 = vadd.f32 %v2300_v24, %v2128_v23  ;;  %v252_v26 = vpop.f32.mrb[1].mxu0 }
 0x14c   :  { %v2995_v27 = vadd.f32 %v2128_v23, %v252_v26 }
 0x14e   :  { %v2556_v29 = vpack.i.bf16 %v2993_v25, %v2995_v27  ;;  %v2456_v30 = vpack.c.bf16 %v2993_v25, %v2995_v27  ;;  %v2303_v31 = vpop.f32.mrb[2].mxu0 }
 0x14f   :  { %v3007_v32 = vadd.f32 %v2303_v31, %v2128_v23  ;;  %v262_v33 = vpop.f32.mrb[3].mxu0 }
 0x150   :  { %2458 = vmatprep.subr.msk.bf16.mxu1 %vm2999_vm1, %v2456_v30  ;;  %v3011_v34 = vadd.f32 %v2128_v23, %v262_v33 }
 0x151   :  { %2461 = vmatpush3.bf16.xpose.msk.msra.mxu1 %vm2999_vm1, %v2456_v30 }
 0x152   :  { %v2561_v35 = vpack.i.bf16 %v3007_v32, %v3011_v34  ;;  %v2462_v36 = vpack.c.bf16 %v3007_v32, %v3011_v34  ;;  %v2306_v37 = vpop.f32.mrb[4].mxu0 }
 0x153   :  { %v3019_v38 = vadd.f32 %v2306_v37, %v2128_v23  ;;  %v272_v39 = vpop.f32.mrb[5].mxu0 }
 0x154   :  { %2464 = vmatprep.subr.msk.bf16.mxu1 %vm2999_vm1, %v2462_v36  ;;  %v3023_v40 = vadd.f32 %v2128_v23, %v272_v39 }
 0x156   :  { %v2566_v42 = vpack.i.bf16 %v3019_v38, %v3023_v40  ;;  %v2468_v43 = vpack.c.bf16 %v3019_v38, %v3023_v40  ;;  %v2309_v44 = vpop.f32.mrb[6].mxu0 }
 0x157   :  { %v3029_v45 = vadd.f32 %v2309_v44, %v2128_v23  ;;  %v282_v46 = vpop.f32.mrb[7].mxu0 }
 0x158   :  { %2327 = vmatmul.mubr.msk.f32.vlgmr.msra.gmra.mrb[0].mxu1 %vm137_vm0, %v332_v41  ;;  %v3032_v47 = vadd.f32 %v2128_v23, %v282_v46 }
 0x159   :  { %2467 = vmatpush3.bf16.xpose.msk.msra.mxu1 %vm2999_vm1, %v2462_v36  ;;  %2333 = vmatprep.mubr.msk.f32.mxu1 %vm137_vm0, %v2984_v22 }
 0x15a   :  { %v2571_v48 = vpack.i.bf16 %v3029_v45, %v3032_v47  ;;  %v2474_v49 = vpack.c.bf16 %v3029_v45, %v3032_v47  ;;  %v2312_v50 = vpop.f32.mrb[8].mxu0  ;;  %2470 = vmatprep.subr.msk.bf16.mxu1 %vm2999_vm1, %v2468_v43 }
 0x15b   :  { %v3044_v51 = vadd.f32 %v2312_v50, %v2128_v23  ;;  %v292_v52 = vpop.f32.mrb[9].mxu0 }
 0x15c   :  { %v3046_v53 = vadd.f32 %v2128_v23, %v292_v52 }
 0x15e   :  { %v2576_v54 = vpack.i.bf16 %v3044_v51, %v3046_v53  ;;  %v2480_v55 = vpack.c.bf16 %v3044_v51, %v3046_v53  ;;  %v2315_v56 = vpop.f32.mrb[10].mxu0 }
 0x15f   :  { %v3052_v57 = vadd.f32 %v2315_v56, %v2128_v23  ;;  %v302_v58 = vpop.f32.mrb[11].mxu0 }
 0x160   :  { %2334 = vmatmul.mubr.msk.f32.vlgmr.msra.gmra.mrb[2].mxu1 %vm137_vm0, %v332_v41  ;;  %v3055_v59 = vadd.f32 %v2128_v23, %v302_v58 }
 0x161   :  { %2473 = vmatpush3.bf16.xpose.msk.msra.mxu1 %vm2999_vm1, %v2468_v43  ;;  %2340 = vmatprep.mubr.msk.f32.mxu1 %vm137_vm0, %v2984_v22 }
 0x162   :  { %v2581_v60 = vpack.i.bf16 %v3052_v57, %v3055_v59  ;;  %v2486_v61 = vpack.c.bf16 %v3052_v57, %v3055_v59  ;;  %v2318_v62 = vpop.f32.mrb[12].mxu0  ;;  %2476 = vmatprep.subr.msk.bf16.mxu1 %vm2999_vm1, %v2474_v49 }
 0x163   :  { %v3067_v63 = vadd.f32 %v2318_v62, %v2128_v23  ;;  %v312_v0 = vpop.f32.mrb[13].mxu0 }
 0x164   :  { %v3069_v1 = vadd.f32 %v2128_v23, %v312_v0 }
 0x166   :  { %v2586_v2 = vpack.i.bf16 %v3067_v63, %v3069_v1  ;;  %v2492_v3 = vpack.c.bf16 %v3067_v63, %v3069_v1  ;;  %v2321_v4 = vpop.f32.mrb[14].mxu0 }
 0x167   :  { %v3075_v5 = vadd.f32 %v2321_v4, %v2128_v23  ;;  %v322_v6 = vpop.f32.mrb[15].mxu0 }
 0x168   :  { %2341 = vmatmul.mubr.msk.f32.vlgmr.msra.gmra.mrb[4].mxu1 %vm137_vm0, %v332_v41  ;;  %2494 = vmatprep.subr.msk.bf16.mxu0 %vm2999_vm1, %v2492_v3  ;;  %v3080_v7 = vadd.f32 %v2128_v23, %v322_v6 }
 0x169   :  { %2479 = vmatpush3.bf16.xpose.msk.msra.mxu1 %vm2999_vm1, %v2474_v49  ;;  %2497 = vmatpush3.bf16.xpose.msk.msra.mxu0 %vm2999_vm1, %v2492_v3 }
 0x16a   :  { %2347 = vmatprep.mubr.msk.f32.mxu1 %vm137_vm0, %v2984_v22  ;;  %2482 = vmatprep.subr.msk.bf16.mxu1 %vm2999_vm1, %v2480_v55  ;;  %v2591_v8 = vpack.i.bf16 %v3075_v5, %v3080_v7  ;;  %v2498_v9 = vpack.c.bf16 %v3075_v5, %v3080_v7 }
 0x170   :  { %2348 = vmatmul.mubr.msk.f32.vlgmr.msra.gmra.mrb[6].mxu1 %vm137_vm0, %v332_v41  ;;  %2369 = vmatmul.mubr.msk.f32.vlgmr.msra.gmra.mrb[16].mxu0 %vm137_vm0, %v332_v41 }
 0x171   :  { %2485 = vmatpush3.bf16.xpose.msk.msra.mxu1 %vm2999_vm1, %v2480_v55  ;;  %2354 = vmatprep.mubr.msk.f32.mxu1 %vm137_vm0, %v2984_v22 }
 0x172   :  { %2488 = vmatprep.subr.msk.bf16.mxu1 %vm2999_vm1, %v2486_v61 }
 0x178   :  { %2355 = vmatmul.mubr.msk.f32.vlgmr.msra.gmra.mrb[8].mxu1 %vm137_vm0, %v332_v41 }
 0x179   :  { %2491 = vmatpush3.bf16.xpose.msk.msra.mxu1 %vm2999_vm1, %v2486_v61  ;;  %2361 = vmatprep.mubr.msk.f32.mxu1 %vm137_vm0, %v2984_v22 }
 0x17a   :  { %2500 = vmatprep.subr.msk.bf16.mxu1 %vm2999_vm1, %v2498_v9 }
 0x180   :  { %2362 = vmatmul.mubr.msk.f32.vlgmr.msra.gmra.mrb[10].mxu1 %vm137_vm0, %v332_v41 }
 0x181   :  { %2503 = vmatpush3.bf16.xpose.msk.msra.mxu1 %vm2999_vm1, %v2498_v9  ;;  %2375 = vmatprep.mubr.msk.f32.mxu1 %vm137_vm0, %v2984_v22 }
 0x188   :  { %2376 = vmatmul.mubr.msk.f32.vlgmr.msra.gmra.mrb[12].mxu1 %vm137_vm0, %v332_v41 }
 0x22b   :  { %v2328_v10 = vpop.f32.mrb[0].mxu1 }
 0x22c   :  { %v411_v11 = vpop.f32.mrb[1].mxu1  ;;  %v991_v12 = vsel %vm987_vm2, %v2328_v10, -inf }
 0x22d   :  { %992 = vmax.xlane.f32.xlu1 %v991_v12  ;;  %v988_v13 = vsel %vm987_vm2, %v411_v11, -inf }
 0x22e   :  { %989 = vmax.xlane.f32.xlu0 %v988_v13 }
 0x233   :  { %v2335_v14 = vpop.f32.mrb[2].mxu1 }
 0x234   :  { %v492_v15 = vpop.f32.mrb[3].mxu1  ;;  %v997_v16 = vsel %vm987_vm2, %v2335_v14, -inf }
 0x235   :  { %998 = vmax.xlane.f32.xlu1 %v997_v16  ;;  %v994_v17 = vsel %vm987_vm2, %v492_v15, -inf }
 0x236   :  { %995 = vmax.xlane.f32.xlu0 %v994_v17 }
 0x23b   :  { %v3119_v18 = vpop.f32.mrb[4].mxu1 }
 0x23c   :  { %v3121_v19 = vpop.f32.mrb[5].mxu1  ;;  %v1003_v20 = vsel %vm987_vm2, %v3119_v18, -inf }
 0x23d   :  { %1004 = vmax.xlane.f32.xlu0 %v1003_v20  ;;  %v1000_v21 = vsel %vm987_vm2, %v3121_v19, -inf }
 0x241   :  { %1001 = vmax.xlane.f32.xlu0 %v1000_v21 }
 0x243   :  { %v3127_v22 = vpop.f32.mrb[6].mxu1  ;;  %v3129_v23 = vpop.f32.mrb[16].mxu0 }
 0x244   :  { %v3131_v24 = vpop.f32.mrb[7].mxu1  ;;  %v1027_v26 = vsel %vm987_vm2, %v3129_v23, -inf  ;;  %v1009_v28 = vsel %vm987_vm2, %v3127_v22, -inf  ;;  %v3137_v30 = vpop.f32.mrb[17].mxu0 }
 0x245   :  { %1028 = vmax.xlane.f32.xlu0 %v1027_v26  ;;  %1010 = vmax.xlane.f32.xlu1 %v1009_v28  ;;  %v1024_v31 = vsel %vm987_vm2, %v3137_v30, -inf  ;;  %v1006_v33 = vsel %vm987_vm2, %v3131_v24, -inf }
 0x249   :  { %1025 = vmax.xlane.f32.xlu0 %v1024_v31  ;;  %1007 = vmax.xlane.f32.xlu1 %v1006_v33 }
 0x24b   :  { %v3143_v36 = vpop.f32.mrb[8].mxu1 }
 0x24c   :  { %v1015_v37 = vsel %vm987_vm2, %v3143_v36, -inf  ;;  %v3147_v39 = vpop.f32.mrb[9].mxu1 }
 0x24d   :  { %1016 = vmax.xlane.f32.xlu0 %v1015_v37  ;;  %v1012_v41 = vsel %vm987_vm2, %v3147_v39, -inf }
 0x251   :  { %1013 = vmax.xlane.f32.xlu0 %v1012_v41 }
 0x253   :  { %v3151_v43 = vpop.f32.mrb[10].mxu1 }
 0x254   :  { %v3153_v44 = vpop.f32.mrb[11].mxu1  ;;  %v1021_v32 = vsel %vm987_vm2, %v3151_v43, -inf }
 0x255   :  { %v1018_v34 = vsel %vm987_vm2, %v3153_v44, -inf }
 0x25a   :  { %2562 = vrot.lane.b32.xlu1 %v2561_v35, %s2832_s5 }
 0x25b   :  { %v3159_v46 = vpop.f32.mrb[12].mxu1 }
 0x25c   :  { %v3161_v49 = vpop.f32.mrb[13].mxu1  ;;  %v1033_v35 = vsel %vm987_vm2, %v3159_v46, -inf }
 0x25d   :  { %v1030_v25 = vsel %vm987_vm2, %v3161_v49, -inf }
 0x25e   :  { %2567 = vrot.lane.b32.xlu1 %v2566_v42, %s2832_s5 }
 0x262   :  { %2572 = vrot.lane.b32.xlu1 %v2571_v48, %s2832_s5 }
 0x267   :  { %2557 = vrot.lane.b32.xlu0 %v2556_v29, %s2832_s5 }
 0x26b   :  { %2577 = vrot.lane.b32.xlu0 %v2576_v54, %s2832_s5 }
 0x286   :  { %1022 = vmax.xlane.f32.xlu1 %v1021_v32 }
 0x28a   :  { %1019 = vmax.xlane.f32.xlu1 %v1018_v34 }
 0x28e   :  { %1034 = vmax.xlane.f32.xlu1 %v1033_v35 }
 0x292   :  { %1031 = vmax.xlane.f32.xlu1 %v1030_v25 }
 0x2a3   :  { %2582 = vrot.lane.b32.xlu1 %v2581_v60, %s2832_s5 }
 0x2ba   :  { %v993_v27 = vpop.xlane.xlu1 %992 }
 0x2bb   :  { %v1037_v29 = vsub.f32 %v2328_v10, %v993_v27  ;;  %v990_v38 = vpop.xlane.xlu0 %989 }
 0x2bc   :  { %v1036_v40 = vsub.f32 %v411_v11, %v990_v38 }
 0x2bd   :  { %v1054_v42 = vmul.f32 1.442695, %v1037_v29 }
 0x2be   :  { %v1052_v45 = vmul.f32 1.442695, %v1036_v40 }
 0x2bf   :  { %2596 = vpow2.f32 %v1054_v42 }
 0x2c0   :  { %2598 = vpow2.f32 %v1052_v45 }
 0x2c2   :  { %v999_v47 = vpop.xlane.xlu1 %998 }
 0x2c3   :  { %v1039_v48 = vsub.f32 %v2335_v14, %v999_v47  ;;  %v996_v50 = vpop.xlane.xlu0 %995 }
 0x2c4   :  { %v1038_v51 = vsub.f32 %v492_v15, %v996_v50 }
 0x2c5   :  { %v1058_v52 = vmul.f32 1.442695, %v1039_v48 }
 0x2c6   :  { %v1056_v53 = vmul.f32 1.442695, %v1038_v51 }
 0x2c7   :  { %2600 = vpow2.f32 %v1058_v52 }
 0x2c8   :  { %2602 = vpow2.f32 %v1056_v53 }
 0x2c9   :  { %v3191_v54 = vpop.eup %2596 }
 0x2ca   :  { %v1005_v55 = vpop.xlane.xlu0 %1004  ;;  %v1087_v56 = vsel %vm987_vm2, %v3191_v54, 0.0  ;;  %v3195_v57 = vpop.eup %2598 }
 0x2cb   :  { %v1041_v58 = vsub.f32 %v3119_v18, %v1005_v55  ;;  %1088 = vadd.xlane.f32.xlu0 %v1087_v56  ;;  %v1084_v61 = vsel %vm987_vm2, %v3195_v57, 0.0 }
 0x2cd   :  { %v1062_v59 = vmul.f32 1.442695, %v1041_v58 }
 0x2ce   :  { %v1002_v60 = vpop.xlane.xlu0 %1001 }
 0x2cf   :  { %2604 = vpow2.f32 %v1062_v59  ;;  %v1040_v62 = vsub.f32 %v3121_v19, %v1002_v60  ;;  %1085 = vadd.xlane.f32.xlu0 %v1084_v61 }
 0x2d1   :  { %v3201_v0 = vpop.eup %2600  ;;  %v1060_v3 = vmul.f32 1.442695, %v1040_v62 }
 0x2d2   :  { %v1029_v4 = vpop.xlane.xlu0 %1028  ;;  %v1011_v6 = vpop.xlane.xlu1 %1010  ;;  %v1093_v9 = vsel %vm987_vm2, %v3201_v0, 0.0 }
 0x2d3   :  { %v3205_v10 = vpop.eup %2602  ;;  %2606 = vpow2.f32 %v1060_v3  ;;  %v1049_v11 = vsub.f32 %v3129_v23, %v1029_v4  ;;  %v1043_v12 = vsub.f32 %v3127_v22, %v1011_v6  ;;  %1094 = vadd.xlane.f32.xlu1 %v1093_v9 }
 0x2d4   :  { %v1090_v17 = vsel %vm987_vm2, %v3205_v10, 0.0 }
 0x2d5   :  { %v1078_v13 = vmul.f32 1.442695, %v1049_v11  ;;  %v1066_v14 = vmul.f32 1.442695, %v1043_v12 }
 0x2d6   :  { %v1026_v15 = vpop.xlane.xlu0 %1025  ;;  %v1008_v16 = vpop.xlane.xlu1 %1007 }
 0x2d7   :  { %2608 = vpow2.f32 %v1078_v13  ;;  %v1048_v18 = vsub.f32 %v3137_v30, %v1026_v15  ;;  %v1042_v19 = vsub.f32 %v3131_v24, %v1008_v16  ;;  %1091 = vadd.xlane.f32.xlu1 %v1090_v17 }
 0x2d8   :  { %2610 = vpow2.f32 %v1066_v14 }
 0x2d9   :  { %v3213_v20 = vpop.eup %2604  ;;  %v1076_v21 = vmul.f32 1.442695, %v1048_v18  ;;  %v1064_v23 = vmul.f32 1.442695, %v1042_v19 }
 0x2da   :  { %v2563_v22 = vpop.permute.xlu1 %2562  ;;  %v1017_v26 = vpop.xlane.xlu0 %1016  ;;  %v1099_v28 = vsel %vm987_vm2, %v3213_v20, 0.0 }
 0x2db   :  { %2612 = vpow2.f32 %v1076_v21  ;;  %v2565_v31 = vunpack.i.h.bf16 %v2563_v22  ;;  %v2564_v33 = vunpack.i.l.bf16 %v2563_v22  ;;  %v1045_v37 = vsub.f32 %v3143_v36, %v1017_v26  ;;  %1100 = vadd.xlane.f32.xlu0 %v1099_v28 }
 0x2dc   :  { %2614 = vpow2.f32 %v1064_v23 }
 0x2dd   :  { %v3218_v30 = vpop.eup %2606  ;;  %v2508_v24 = vpack.c.bf16 %v2565_v31, %v2564_v33  ;;  %v1070_v41 = vmul.f32 1.442695, %v1045_v37 }
 0x2de   :  { %v2568_v32 = vpop.permute.xlu1 %2567  ;;  %v1014_v34 = vpop.xlane.xlu0 %1013  ;;  %v1096_v35 = vsel %vm987_vm2, %v3218_v30, 0.0 }
 0x2df   :  { %2616 = vpow2.f32 %v1070_v41  ;;  %v1044_v25 = vsub.f32 %v3147_v39, %v1014_v34  ;;  %2509 = vmatprep.subr.bf16.mxu1 %v2508_v24  ;;  %1097 = vadd.xlane.f32.xlu0 %v1096_v35  ;;  %v2570_v50 = vunpack.i.h.bf16 %v2568_v32  ;;  %v2569_v39 = vunpack.i.l.bf16 %v2568_v32 }
 0x2e0   :  { %2511 = vmatpush3.bf16.msra.mxu1 %v2508_v24 }
 0x2e1   :  { %v3223_v27 = vpop.eup %2608  ;;  %v1068_v36 = vmul.f32 1.442695, %v1044_v25  ;;  %v2512_v61 = vpack.c.bf16 %v2570_v50, %v2569_v39 }
 0x2e2   :  { %v3225_v29 = vpop.eup %2610  ;;  %v2573_v38 = vpop.permute.xlu1 %2572  ;;  %v1123_v42 = vsel %vm987_vm2, %v3223_v27, 0.0 }
 0x2e3   :  { %v2558_v40 = vpop.permute.xlu0 %2557  ;;  %2618 = vpow2.f32 %v1068_v36  ;;  %v2575_v45 = vunpack.i.h.bf16 %v2573_v38  ;;  %v2574_v47 = vunpack.i.l.bf16 %v2573_v38  ;;  %1124 = vadd.xlane.f32.xlu0 %v1123_v42  ;;  %v1105_v52 = vsel %vm987_vm2, %v3225_v29, 0.0 }
 0x2e4   :  { %v2560_v48 = vunpack.i.h.bf16 %v2558_v40  ;;  %v2559_v51 = vunpack.i.l.bf16 %v2558_v40  ;;  %1106 = vadd.xlane.f32.xlu1 %v1105_v52 }
 0x2e5   :  { %v3231_v53 = vpop.eup %2612  ;;  %v3233_v55 = vpack.c.bf16 %v2575_v45, %v2574_v47 }
 0x2e6   :  { %v3235_v56 = vpop.eup %2614  ;;  %v2504_v58 = vpack.c.bf16 %v2560_v48, %v2559_v51  ;;  %v1120_v59 = vsel %vm987_vm2, %v3231_v53, 0.0 }
 0x2e7   :  { %2517 = vmatprep.subr.bf16.mxu1 %v3233_v55  ;;  %1121 = vadd.xlane.f32.xlu0 %v1120_v59  ;;  %v1102_v60 = vsel %vm987_vm2, %v3235_v56, 0.0  ;;  %v2578_v26 = vpop.permute.xlu0 %2577 }
 0x2e8   :  { %2505 = vmatprep.subr.bf16.mxu0 %v2504_v58  ;;  %1103 = vadd.xlane.f32.xlu1 %v1102_v60  ;;  %v2580_v34 = vunpack.i.h.bf16 %v2578_v26  ;;  %v2579_v35 = vunpack.i.l.bf16 %v2578_v26 }
 0x2e9   :  { %v3242_v62 = vpop.eup %2616  ;;  %2507 = vmatpush3.bf16.msra.mxu0 %v2504_v58 }
 0x2ea   :  { %2513 = vmatprep.subr.bf16.mxu0 %v2512_v61  ;;  %v1111_v3 = vsel %vm987_vm2, %v3242_v62, 0.0  ;;  %v2520_v7 = vpack.c.bf16 %v2580_v34, %v2579_v35  ;;  %v3311_v34 = vld [vmem:[#allocation7] sm:$0xff] }
 0x2eb   :  { %1112 = vadd.xlane.f32.xlu0 %v1111_v3 }
 0x2ed   :  { %v3246_v4 = vpop.eup %2618 }
 0x2ee   :  { %v1108_v6 = vsel %vm987_vm2, %v3246_v4, 0.0 }
 0x2ef   :  { %1109 = vadd.xlane.f32.xlu0 %v1108_v6 }
 0x305   :  { %2587 = vrot.lane.b32.xlu0 %v2586_v2, %s2832_s5 }
 0x313   :  { %v1023_v9 = vpop.xlane.xlu1 %1022 }
 0x314   :  { %v1047_v11 = vsub.f32 %v3151_v43, %v1023_v9 }
 0x316   :  { %v1074_v12 = vmul.f32 1.442695, %v1047_v11 }
 0x317   :  { %v1020_v13 = vpop.xlane.xlu1 %1019 }
 0x318   :  { %2620 = vpow2.f32 %v1074_v12  ;;  %v1046_v14 = vsub.f32 %v3153_v44, %v1020_v13 }
 0x31a   :  { %v1072_v15 = vmul.f32 1.442695, %v1046_v14 }
 0x31b   :  { %v1035_v16 = vpop.xlane.xlu1 %1034 }
 0x31c   :  { %2622 = vpow2.f32 %v1072_v15  ;;  %v1051_v17 = vsub.f32 %v3159_v46, %v1035_v16 }
 0x31e   :  { %v1082_v18 = vmul.f32 1.442695, %v1051_v17 }
 0x31f   :  { %v1032_v19 = vpop.xlane.xlu1 %1031 }
 0x320   :  { %2624 = vpow2.f32 %v1082_v18  ;;  %v1050_v21 = vsub.f32 %v3161_v49, %v1032_v19 }
 0x322   :  { %v3258_v63 = vpop.eup %2620  ;;  %v1080_v1 = vmul.f32 1.442695, %v1050_v21 }
 0x323   :  { %v1117_v2 = vsel %vm987_vm2, %v3258_v63, 0.0  ;;  %v2583_v31 = vpop.permute.xlu1 %2582 }
 0x324   :  { %2626 = vpow2.f32 %v1080_v1  ;;  %1118 = vadd.xlane.f32.xlu1 %v1117_v2  ;;  %v2585_v42 = vunpack.i.h.bf16 %v2583_v31  ;;  %v2584_v45 = vunpack.i.l.bf16 %v2583_v31 }
 0x326   :  { %v3262_v43 = vpop.eup %2622  ;;  %v2524_v50 = vpack.c.bf16 %v2585_v42, %v2584_v45 }
 0x327   :  { %v1114_v44 = vsel %vm987_vm2, %v3262_v43, 0.0 }
 0x328   :  { %1115 = vadd.xlane.f32.xlu1 %v1114_v44 }
 0x32a   :  { %v3266_v46 = vpop.eup %2624 }
 0x32b   :  { %v1129_v23 = vsel %vm987_vm2, %v3266_v46, 0.0 }
 0x32c   :  { %1130 = vadd.xlane.f32.xlu1 %v1129_v23 }
 0x32e   :  { %v3270_v49 = vpop.eup %2626 }
 0x32f   :  { %v1126_v22 = vsel %vm987_vm2, %v3270_v49, 0.0 }
 0x330   :  { %1127 = vadd.xlane.f32.xlu1 %v1126_v22 }
 0x341   :  { %2592 = vrot.lane.b32.xlu1 %v2591_v8, %s2832_s5 }
 0x358   :  { %v1089_v28 = vpop.xlane.xlu0 %1088 }
 0x359   :  { %2628 = vrcp.f32 %v1089_v28 }
 0x35c   :  { %v1086_v33 = vpop.xlane.xlu0 %1085 }
 0x35d   :  { %2630 = vrcp.f32 %v1086_v33 }
 0x360   :  { %v1095_v37 = vpop.xlane.xlu1 %1094 }
 0x361   :  { %2632 = vrcp.f32 %v1095_v37 }
 0x363   :  { %v2629_v41 = vpop.eup %2628 }
 0x364   :  { %v1092_v24 = vpop.xlane.xlu1 %1091  ;;  %v1149_v5 = vmul.f32 %v2629_v41, %v3191_v54  ;;  %v1962_v41 = vld [vmem:[#allocation11 + $0x18] sm:$0xff] }
 0x365   :  { %2634 = vrcp.f32 %v1092_v24  ;;  %v1961_v24 = vld [vmem:[#allocation11 + $0x10] sm:$0xff] }
 0x367   :  { %v2631_v32 = vpop.eup %2630 }
 0x368   :  { %v1101_v25 = vpop.xlane.xlu0 %1100  ;;  %v1148_v36 = vmul.f32 %v2631_v32, %v3195_v57  ;;  %v2540_v32 = vpack.c.bf16 %v1962_v41, %v1961_v24 }
 0x369   :  { %2636 = vrcp.f32 %v1101_v25 }
 0x36a   :  { %2382 = vmatprep.mubr.msk.f32.mxu0 %vm987_vm2, %v1148_v36 }
 0x36b   :  { %2383 = vmatmul.mubr.msk.f32.vlgmr.msra.gmra.mrb[18].mxu0 %vm987_vm2, %v1149_v5  ;;  %v2633_v38 = vpop.eup %2632 }
 0x36c   :  { %2515 = vmatpush3.bf16.msra.mxu0 %v2512_v61  ;;  %v1098_v8 = vpop.xlane.xlu0 %1097  ;;  %v1151_v57 = vmul.f32 %v2633_v38, %v3201_v0 }
 0x36d   :  { %2638 = vrcp.f32 %v1098_v8  ;;  %2521 = vmatprep.subr.bf16.mxu0 %v2520_v7 }
 0x36f   :  { %v2635_v40 = vpop.eup %2634 }
 0x370   :  { %v1125_v47 = vpop.xlane.xlu0 %1124  ;;  %v1150_v48 = vmul.f32 %v2635_v40, %v3205_v10 }
 0x371   :  { %v1107_v54 = vpop.xlane.xlu1 %1106 }
 0x372   :  { %2389 = vmatprep.mubr.msk.f32.mxu1 %vm987_vm2, %v1150_v48  ;;  %2640 = vrcp.f32 %v1107_v54 }
 0x373   :  { %2390 = vmatmul.mubr.msk.f32.vlgmr.msra.gmra.mrb[14].mxu1 %vm987_vm2, %v1151_v57  ;;  %v2637_v51 = vpop.eup %2636 }
 0x374   :  { %2519 = vmatpush3.bf16.msra.mxu1 %v3233_v55  ;;  %v1122_v39 = vpop.xlane.xlu0 %1121  ;;  %v1153_v0 = vmul.f32 %v2637_v51, %v3213_v20 }
 0x375   :  { %2525 = vmatprep.subr.bf16.mxu1 %v2524_v50  ;;  %v1104_v52 = vpop.xlane.xlu1 %1103 }
 0x376   :  { %2642 = vrcp.f32 %v1104_v52  ;;  %v3319_v52 = vld [vmem:[#allocation2] sm:$0xf] }
 0x377   :  { %v2639_v58 = vpop.eup %2638  ;;  %2644 = vrcp.f32 %v1122_v39 }
 0x378   :  { %v1113_v59 = vpop.xlane.xlu0 %1112  ;;  %v1152_v10 = vmul.f32 %v2639_v58, %v3218_v30 }
 0x379   :  { %2646 = vrcp.f32 %v1113_v59 }
 0x37a   :  { %2396 = vmatprep.mubr.msk.f32.mxu0 %vm987_vm2, %v1152_v10 }
 0x37b   :  { %2397 = vmatmul.mubr.msk.f32.vlgmr.msra.gmra.mrb[20].mxu0 %vm987_vm2, %v1153_v0 }
 0x37c   :  { %2523 = vmatpush3.bf16.msra.mxu0 %v2520_v7  ;;  %v1110_v55 = vpop.xlane.xlu0 %1109  ;;  %v2641_v60 = vpop.eup %2640 }
 0x37d   :  { %2648 = vrcp.f32 %v1110_v55  ;;  %v1155_v30 = vmul.f32 %v2641_v60, %v3225_v29 }
 0x37e   :  { %2650 = vrcp.f32 %v1125_v47 }
 0x380   :  { %v2588_v61 = vpop.permute.xlu0 %2587  ;;  %v2643_v3 = vpop.eup %2642 }
 0x381   :  { %v2590_v6 = vunpack.i.h.bf16 %v2588_v61  ;;  %v2589_v9 = vunpack.i.l.bf16 %v2588_v61  ;;  %v1154_v11 = vmul.f32 %v2643_v3, %v3235_v56  ;;  %v2645_v12 = vpop.eup %2644 }
 0x382   :  { %v1160_v56 = vmul.f32 %v2645_v12, %v3231_v53 }
 0x383   :  { %v2528_v20 = vpack.c.bf16 %v2590_v6, %v2589_v9  ;;  %2403 = vmatprep.mubr.msk.f32.mxu1 %vm987_vm2, %v1154_v11  ;;  %v2647_v13 = vpop.eup %2646 }
 0x384   :  { %2404 = vmatmul.mubr.msk.f32.vlgmr.msra.gmra.mrb[16].mxu1 %vm987_vm2, %v1155_v30  ;;  %v1157_v16 = vmul.f32 %v2647_v13, %v3242_v62 }
 0x385   :  { %2529 = vmatprep.subr.bf16.mxu0 %v2528_v20  ;;  %2527 = vmatpush3.bf16.msra.mxu1 %v2524_v50 }
 0x387   :  { %v2649_v14 = vpop.eup %2648 }
 0x388   :  { %v1156_v15 = vmul.f32 %v2649_v14, %v3246_v4  ;;  %v2651_v17 = vpop.eup %2650 }
 0x389   :  { %v1161_v29 = vmul.f32 %v2651_v17, %v3223_v27 }
 0x38a   :  { %2410 = vmatprep.mubr.msk.f32.mxu0 %vm987_vm2, %v1156_v15 }
 0x38b   :  { %2411 = vmatmul.mubr.msk.f32.vlgmr.msra.gmra.mrb[22].mxu0 %vm987_vm2, %v1157_v16 }
 0x38c   :  { %2531 = vmatpush3.bf16.msra.mxu0 %v2528_v20  ;;  %2424 = vmatprep.mubr.msk.f32.mxu0 %vm987_vm2, %v1160_v56 }
 0x38f   :  { %2425 = vmatmul.mubr.msk.f32.vlgmr.msra.gmra.mrb[24].mxu0 %vm987_vm2, %v1161_v29 }
 0x3b1   :  { %v1119_v18 = vpop.xlane.xlu1 %1118 }
 0x3b2   :  { %2652 = vrcp.f32 %v1119_v18 }
 0x3b5   :  { %v1116_v19 = vpop.xlane.xlu1 %1115 }
 0x3b6   :  { %2654 = vrcp.f32 %v1116_v19 }
 0x3b9   :  { %v1131_v4 = vpop.xlane.xlu1 %1130 }
 0x3ba   :  { %2656 = vrcp.f32 %v1131_v4 }
 0x3bc   :  { %v2653_v21 = vpop.eup %2652 }
 0x3bd   :  { %v1128_v62 = vpop.xlane.xlu1 %1127  ;;  %v1159_v44 = vmul.f32 %v2653_v21, %v3258_v63  ;;  %v1959_v63 = vld [vmem:[#allocation11] sm:$0xff] }
 0x3be   :  { %2658 = vrcp.f32 %v1128_v62 }
 0x3c0   :  { %v2655_v1 = vpop.eup %2654 }
 0x3c1   :  { %v2593_v53 = vpop.permute.xlu1 %2592  ;;  %v1158_v2 = vmul.f32 %v2655_v1, %v3262_v43  ;;  %v1960_v43 = vld [vmem:[#allocation11 + $0x8] sm:$0xff] }
 0x3c2   :  { %v2595_v23 = vunpack.i.h.bf16 %v2593_v53  ;;  %v2594_v22 = vunpack.i.l.bf16 %v2593_v53  ;;  %v2536_v37 = vpack.c.bf16 %v1960_v43, %v1959_v63 }
 0x3c3   :  { %2417 = vmatprep.mubr.msk.f32.mxu1 %vm987_vm2, %v1158_v2 }
 0x3c4   :  { %v2532_v27 = vpack.c.bf16 %v2595_v23, %v2594_v22  ;;  %2418 = vmatmul.mubr.msk.f32.vlgmr.msra.gmra.mrb[18].mxu1 %vm987_vm2, %v1159_v44  ;;  %v2657_v26 = vpop.eup %2656  ;;  %2537 = vmatprep.subr.bf16.mxu0 %v2536_v37 }
 0x3c5   :  { %v1163_v33 = vmul.f32 %v2657_v26, %v3266_v46  ;;  %2539 = vmatpush3.bf16.msra.mxu0 %v2536_v37 }
 0x3c6   :  { %2533 = vmatprep.subr.bf16.mxu1 %v2532_v27  ;;  %2541 = vmatprep.subr.bf16.mxu0 %v2540_v32 }
 0x3c7   :  { %2535 = vmatpush3.bf16.msra.mxu1 %v2532_v27 }
 0x3c8   :  { %v2659_v28 = vpop.eup %2658 }
 0x3c9   :  { %v1162_v31 = vmul.f32 %v2659_v28, %v3270_v49  ;;  %2543 = vmatpush3.bf16.msra.mxu0 %v2540_v32  ;;  %v3313_v49 = vld [vmem:[#allocation7 + $0x8] sm:$0xff] }
 0x3cb   :  { %2431 = vmatprep.mubr.msk.f32.mxu1 %vm987_vm2, %v1162_v31 }
 0x3cc   :  { %2432 = vmatmul.mubr.msk.f32.vlgmr.msra.gmra.mrb[20].mxu1 %vm987_vm2, %v1163_v33 }
 0x43e   :  { %v2384_v35 = vpop.f32.mrb[18].mxu0 }
 0x43f   :  { %v1242_v46 = vpop.f32.mrb[19].mxu0  ;;  %v1863_v36 = vmul.f32 %v2384_v35, %v3313_v49 }
 0x440   :  { %v1862_v25 = vmul.f32 %v3311_v34, %v1242_v46 }
 0x441   :  { %v1926_v8 = vrot.slane %v1863_v36, 4 }
 0x442   :  { %v1886_v5 = vrot.slane %v1862_v25, 4 }
 0x444   :  { %v1902_v7 = vadd.f32 %v1886_v5, %v1862_v25 }
 0x446   :  { %v1910_v38 = vadd.f32 %v1902_v7, %v1863_v36  ;;  %v2391_v40 = vpop.f32.mrb[14].mxu1 }
 0x447   :  { %v1329_v42 = vpop.f32.mrb[15].mxu1  ;;  %v1865_v48 = vmul.f32 %v2391_v40, %v3313_v49 }
 0x448   :  { %v1942_v45 = vadd.f32 %v1926_v8, %v1910_v38  ;;  %v1864_v47 = vmul.f32 %v3311_v34, %v1329_v42 }
 0x449   :  { %v1927_v50 = vrot.slane %v1865_v48, 4 }
 0x44a   :  { %v1887_v57 = vrot.slane %v1864_v47, 4  ;;  %v3323_v0 = vadd.f32 %v3319_v52, %v1942_v45 }
 0x44c   :  { %v1903_v54 = vadd.f32 %v1887_v57, %v1864_v47 }
 0x44e   :  { %v1911_v39 = vadd.f32 %v1903_v54, %v1865_v48  ;;  %v2398_v51 = vpop.f32.mrb[20].mxu0 }
 0x44f   :  { %v1416_v58 = vpop.f32.mrb[21].mxu0  ;;  %v1867_v60 = vmul.f32 %v2398_v51, %v3313_v49 }
 0x450   :  { %v1943_v59 = vadd.f32 %v1927_v50, %v1911_v39  ;;  %v1866_v10 = vmul.f32 %v3311_v34, %v1416_v58 }
 0x451   :  { %v1928_v9 = vrot.slane %v1867_v60, 4 }
 0x452   :  { %v3326_v55 = vadd.f32 %v3319_v52, %v1943_v59  ;;  %v1888_v61 = vrot.slane %v1866_v10, 4 }
 0x454   :  { %v1904_v3 = vadd.f32 %v1888_v61, %v1866_v10  ;;  %v1978_v6 = vcombine.low %v3323_v0, %v3326_v55 }
 0x456   :  { %v1912_v11 = vadd.f32 %v1904_v3, %v1867_v60  ;;  %2442 = vmatprep.mubr.msk.f32.mxu0 %vm137_vm0, %v1978_v6 }
 0x457   :  { %v2405_v20 = vpop.f32.mrb[16].mxu1 }
 0x458   :  { %v1944_v30 = vadd.f32 %v1928_v9, %v1912_v11  ;;  %v1503_v12 = vpop.f32.mrb[17].mxu1  ;;  %v1869_v14 = vmul.f32 %v2405_v20, %v3313_v49 }
 0x459   :  { %v1868_v13 = vmul.f32 %v3311_v34, %v1503_v12 }
 0x45a   :  { %v1929_v29 = vrot.slane %v1869_v14, 4  ;;  %v1953_v2 = vadd.f32 %v3319_v52, %v1944_v30 }
 0x45b   :  { %v1889_v15 = vrot.slane %v1868_v13, 4 }
 0x45d   :  { %v1905_v16 = vadd.f32 %v1889_v15, %v1868_v13 }
 0x45e   :  { %v2412_v17 = vpop.f32.mrb[22].mxu0 }
 0x45f   :  { %v1590_v56 = vpop.f32.mrb[23].mxu0  ;;  %v1913_v18 = vadd.f32 %v1905_v16, %v1869_v14  ;;  %v1871_v4 = vmul.f32 %v2412_v17, %v3313_v49 }
 0x460   :  { %v1870_v19 = vmul.f32 %v3311_v34, %v1590_v56 }
 0x461   :  { %v1945_v62 = vadd.f32 %v1929_v29, %v1913_v18  ;;  %v1930_v27 = vrot.slane %v1871_v4, 4 }
 0x462   :  { %v1890_v21 = vrot.slane %v1870_v19, 4  ;;  %v2426_v1 = vpop.f32.mrb[24].mxu0 }
 0x463   :  { %v1764_v53 = vpop.f32.mrb[25].mxu0  ;;  %v1954_v44 = vadd.f32 %v3319_v52, %v1945_v62  ;;  %v1875_v31 = vmul.f32 %v2426_v1, %v3313_v49 }
 0x464   :  { %v1906_v23 = vadd.f32 %v1890_v21, %v1870_v19  ;;  %v1874_v22 = vmul.f32 %v3311_v34, %v1764_v53 }
 0x465   :  { %v1979_v26 = vcombine.low %v1953_v2, %v1954_v44  ;;  %v1932_v37 = vrot.slane %v1875_v31, 4 }
 0x466   :  { %v1914_v28 = vadd.f32 %v1906_v23, %v1871_v4  ;;  %v1892_v33 = vrot.slane %v1874_v22, 4 }
 0x467   :  { %2443 = vmatmul.mubr.msk.f32.vlgmr.msra.gmra.mrb[26].mxu0 %vm137_vm0, %v1979_v26 }
 0x468   :  { %v1946_v63 = vadd.f32 %v1930_v27, %v1914_v28  ;;  %v1908_v43 = vadd.f32 %v1892_v33, %v1874_v22 }
 0x46a   :  { %v1916_v24 = vadd.f32 %v1908_v43, %v1875_v31  ;;  %v1955_v47 = vadd.f32 %v3319_v52, %v1946_v63 }
 0x46c   :  { %v1948_v41 = vadd.f32 %v1932_v37, %v1916_v24 }
 0x46e   :  { %v1957_v10 = vadd.f32 %v3319_v52, %v1948_v41 }
 0x497   :  { %v2419_v32 = vpop.f32.mrb[18].mxu1 }
 0x498   :  { %v1677_v35 = vpop.f32.mrb[19].mxu1  ;;  %v1873_v25 = vmul.f32 %v2419_v32, %v3313_v49 }
 0x499   :  { %v1872_v46 = vmul.f32 %v3311_v34, %v1677_v35 }
 0x49a   :  { %v1931_v7 = vrot.slane %v1873_v25, 4 }
 0x49b   :  { %v1891_v36 = vrot.slane %v1872_v46, 4 }
 0x49d   :  { %v1907_v5 = vadd.f32 %v1891_v36, %v1872_v46 }
 0x49f   :  { %v1915_v8 = vadd.f32 %v1907_v5, %v1873_v25  ;;  %v2433_v38 = vpop.f32.mrb[20].mxu1 }
 0x4a0   :  { %v1851_v40 = vpop.f32.mrb[21].mxu1  ;;  %v1877_v57 = vmul.f32 %v2433_v38, %v3313_v49 }
 0x4a1   :  { %v1947_v42 = vadd.f32 %v1931_v7, %v1915_v8  ;;  %v1876_v45 = vmul.f32 %v3311_v34, %v1851_v40  ;;  %v2193_v34 = vld [vmem:[%s3383_s7] ss:$0 sm:$0xff]  ;;  %s2833_s7 = smov [#allocation13]  }
 0x4a2   :  { %v1933_v51 = vrot.slane %v1877_v57, 4  ;;  %s2113_s22 = sshll.u32 %s2833_s7, 4  ;;  %s2114_s22 = int_to_ptr.vmem [resolvable:$true] %s2113_s22 }
 0x4a3   :  { %v1956_v48 = vadd.f32 %v3319_v52, %v1947_v42  ;;  %v1893_v54 = vrot.slane %v1876_v45, 4  ;;  %s2792_s10 = scalar_lea.vmem %s2114_s22, 512  ;;  %p2797_p7 = scmp.lt.s32.totalorder %s2114_s22, %s2114_s22 }
 0x4a4   :  { %p2793_p6 = scmp.ne.s32.totalorder %s2114_s22, %s2792_s10  ;;  %p2798_p8 = scmp.lt.s32.totalorder %s2792_s10, %s2792_s10 }
 0x4a5   :  { %v1909_v50 = vadd.f32 %v1893_v54, %v1876_v45  ;;  %v1980_v39 = vcombine.low %v1955_v47, %v1956_v48 }
 0x4a6   :  { %p2799_p9 = por %p2798_p8, %p2797_p7 }
 0x4a7   :  { %v1917_v58 = vadd.f32 %v1909_v50, %v1877_v57  ;;  %2445 = vmatprep.mubr.msk.f32.mxu0 %vm137_vm0, %v1980_v39 }
 0x4a8   :  { %p2800_p10 = pnand %p2799_p9, %p2793_p6 }
 0x4a9   :  { %v1949_v59 = vadd.f32 %v1933_v51, %v1917_v58 }
 0x4ab   :  { %v1958_v60 = vadd.f32 %v3319_v52, %v1949_v59 }
 0x4ad   :  { %v1981_v61 = vcombine.low %v1957_v10, %v1958_v60 }
 0x4af   :  { %2446 = vmatmul.mubr.msk.f32.gmra.mrb[28].mxu0 %vm137_vm0, %v1981_v61 }
 0x53a   :  { %v2444_v49 = vpop.f32.mrb[26].mxu0 }
 0x53b   :  { %v2062_v3 = vadd.f32 %v2444_v49, %v2193_v34  ;;  %v2056_v6 = vpop.f32.mrb[27].mxu0 }
 0x53c   :  { %v2057_v9 = vadd.f32 %v2193_v34, %v2056_v6 }
 0x53d   :  { %v2076_v11 = vmax.f32 %v2062_v3, 0.0 }
 0x53e   :  { %v2075_v30 = vmax.f32 %v2057_v9, 0.0 }
 0x53f   :  { %v2084_v20 = vcombine.high %v2076_v11, %v2076_v11  ;;  %v2093_v12 = vadd.f32 %v2076_v11, %v1953_v2 }
 0x540   :  { %v2083_v13 = vcombine.high %v2075_v30, %v2075_v30  ;;  %v2091_v14 = vadd.f32 %v2075_v30, %v3323_v0 }
 0x541   :  { %v2094_v52 = vadd.f32 %v2084_v20, %v1954_v44  ;;  %2102 = vst.msk [vmem:[#allocation13 + $0x8] sm:$0xf] %vm2099_vm3, %v2093_v12 }
 0x542   :  { %v2092_v15 = vadd.f32 %v2083_v13, %v3326_v55  ;;  %2100 = vst.msk [vmem:[#allocation13] sm:$0xf] %vm2099_vm3, %v2091_v14 }
 0x543   :  { %2103 = vst.msk [vmem:[#allocation13 + $0xc] sm:$0xf] %vm2099_vm3, %v2094_v52 }
 0x544   :  { %2101 = vst.msk [vmem:[#allocation13 + $0x4] sm:$0xf] %vm2099_vm3, %v2092_v15 }
 0x582   :  { %v2447_v16 = vpop.f32.mrb[28].mxu0 }
 0x583   :  { %v2072_v17 = vadd.f32 %v2447_v16, %v2193_v34  ;;  %v2066_v56 = vpop.f32.mrb[29].mxu0 }
 0x584   :  { %v2067_v29 = vadd.f32 %v2193_v34, %v2066_v56 }
 0x585   :  { %v2078_v18 = vmax.f32 %v2072_v17, 0.0 }
 0x586   :  { %v2077_v19 = vmax.f32 %v2067_v29, 0.0 }
 0x587   :  { %v2086_v4 = vcombine.high %v2078_v18, %v2078_v18  ;;  %v2097_v62 = vadd.f32 %v2078_v18, %v1957_v10 }
 0x588   :  { %v2085_v0 = vcombine.high %v2077_v19, %v2077_v19  ;;  %v2095_v21 = vadd.f32 %v2077_v19, %v1955_v47 }
 0x589   :  { %v2098_v1 = vadd.f32 %v2086_v4, %v1958_v60  ;;  %2106 = vst.msk [vmem:[#allocation13 + $0x18] sm:$0xf] %vm2099_vm3, %v2097_v62 }
 0x58a   :  { %v2096_v55 = vadd.f32 %v2085_v0, %v1956_v48  ;;  %2104 = vst.msk [vmem:[#allocation13 + $0x10] sm:$0xf] %vm2099_vm3, %v2095_v21 }
 0x58b   :  { %2107 = vst.msk [vmem:[#allocation13 + $0x1c] sm:$0xf] %vm2099_vm3, %v2098_v1 }
 0x58c   :  { %2105 = vst.msk [vmem:[#allocation13 + $0x14] sm:$0xf] %vm2099_vm3, %v2096_v55 }
 0x58d   :  { %2803 = shalt.err (!%p2800_p10)
}
 0x58e   :  { %s2804_s13 = scalar_lea.hbm %s3384_s8, 512 }
 0x58f   :  { %p2805_p11 = scmp.ne.s32.totalorder %s3384_s8, %s2804_s13  ;;  %p2808_p12 = scmp.lt.u32.totalorder %s2804_s13, %s3384_s8 }
 0x591   :  { %p2810_p13 = pnand %p2808_p12, %p2805_p11 }
 0x593   :  { %2813 = shalt.err (!%p2810_p13)
}
 0x594   :  { %s2834_s3 = smov 64   ;;  %s2835_s2 = smov 4  }
 0x595   :  { %2119 = dma.vmem_to_hbm [thread:$0]  %s2114_s22, 512, %s3384_s8, [#allocation4], %s2834_s3, %s2834_s3, %s2835_s2  }
 0x596   :  { %2822 = dma.done.wait [#allocation4], 512  }
 0x597   :  { %2823 = vsyncadd [#allocation4], 4294966784 }
 0x598   :  { %2123 = vsyncpa [#allocation3], 1 }
 0x599   :  { %2124 = vsyncpa [#allocation6], 1 }
 0x59a   :  { %2125 = vsyncpa [#allocation9], 1 }
 0x59b   :  { %2126 = vsyncpa [#allocation12], 1 }
 0x59c   :  { %2127 = vsyncpa [#allocation4], 1 }

</bundles_post_ra>
